<compile_context>
chip_gen: v7x
topology: tpu7x:2x2x1
jax: 0.10.0
libtpu: 0.0.40
codegen_flags: <defaults>
</compile_context>

<pallas_src>
import functools

import jax
import jax.numpy as jnp
from jax.experimental import pallas as pl
from jax.experimental.pallas import tpu as pltpu


DROPOUT_P = 0.25
# keep w.p. (1-p) via signed-int32 threshold compare on uniform random bits:
#   P(int32_bits < t) = (t + 2^31) / 2^32  =>  t = (1-p)*2^32 - 2^31
_KEEP_THRESHOLD_I32 = int(round((1.0 - DROPOUT_P) * 2**32)) - 2**31  # == 2**30


def _round_up(x, m):
    return (x + m - 1) // m * m


def p_net_kernel(x_ref, bits1_ref, bits2_ref,
                 w1_ref, b1_ref, w2_ref, b2_ref, w3_ref, b3_ref,
                 o_ref, *, train):
    # lin1 (bf16 MXU operands, f32 accumulate) + bias
    h = jnp.dot(x_ref[...], w1_ref[...],
                preferred_element_type=jnp.float32) + b1_ref[...]
    if train:
        # dropout(p=0.25): pure select; the 1/(1-p) rescale is folded into w2.
        h = jnp.where(bits1_ref[...] < _KEEP_THRESHOLD_I32, h, 0.0)
    h = jnp.maximum(h, 0.0)                                   # ReLU

    # lin2
    h = jnp.dot(h.astype(w2_ref.dtype), w2_ref[...],
                preferred_element_type=jnp.float32) + b2_ref[...]
    if train:
        # dropout(p=0.25): rescale folded into w3.
        h = jnp.where(bits2_ref[...] < _KEEP_THRESHOLD_I32, h, 0.0)

    # lin3 + sigmoid (exp goes to the EUP; division is a tiny f32 epilogue)
    h = jnp.dot(h.astype(w3_ref.dtype), w3_ref[...],
                preferred_element_type=jnp.float32) + b3_ref[...]
    o_ref[...] = (1.0 / (1.0 + jnp.exp(-h))).astype(o_ref.dtype)


@functools.partial(jax.jit, static_argnames=("train", "tile_b"))
def p_net_forward(x, params, key, train=True, tile_b=128):
    """x: [B, z_dim] f32. params: prepared (bf16 weights, f32 biases)."""
    w1, b1, w2, b2, w3, b3 = params
    B, z_dim = x.shape
    N = w1.shape[1]
    X_dim = w3.shape[1]

    # Batch tiling: >=8-row (sublane) multiples, up to 128-row tiles.
    tb = min(tile_b, _round_up(B, 8))
    Bp = _round_up(B, tb)
    grid = (Bp // tb,)

    xp = x.astype(w1.dtype)
    if Bp != B:
        xp = jnp.pad(xp, ((0, Bp - B), (0, 0)))

    # Dropout randomness generated outside the kernel (portable: runs in
    # interpret mode and on TPU alike); one draw per hidden activation.
    k1, k2 = jax.random.split(key)
    bits1 = jax.lax.bitcast_convert_type(
        jax.random.bits(k1, (Bp, N), dtype=jnp.uint32), jnp.int32)
    bits2 = jax.lax.bitcast_convert_type(
        jax.random.bits(k2, (Bp, N), dtype=jnp.uint32), jnp.int32)

    # NOTE: for realistic AAE sizes (N~1000, X_dim=784) pad N/X_dim up to
    # multiples of 128 for lane-dense stores, and cap tb / set
    # vmem_limit_bytes for v7x's 64 MiB VMEM.
    out = pl.pallas_call(
        functools.partial(p_net_kernel, train=train),
        out_shape=jax.ShapeDtypeStruct((Bp, X_dim), jnp.float32),
        grid=grid,
        in_specs=[
            pl.BlockSpec((tb, z_dim), lambda i: (i, 0)),      # x tile
            pl.BlockSpec((tb, N), lambda i: (i, 0)),          # dropout bits 1
            pl.BlockSpec((tb, N), lambda i: (i, 0)),          # dropout bits 2
            pl.BlockSpec((z_dim, N), lambda i: (0, 0)),       # w1 (resident)
            pl.BlockSpec((1, N), lambda i: (0, 0)),           # b1
            pl.BlockSpec((N, N), lambda i: (0, 0)),           # w2
            pl.BlockSpec((1, N), lambda i: (0, 0)),           # b2
            pl.BlockSpec((N, X_dim), lambda i: (0, 0)),       # w3
            pl.BlockSpec((1, X_dim), lambda i: (0, 0)),       # b3
        ],
        out_specs=pl.BlockSpec((tb, X_dim), lambda i: (i, 0)),
        compiler_params=pltpu.CompilerParams(
            dimension_semantics=("parallel",)),               # v7x: 2 TCs
    )(xp, bits1, bits2, w1, b1, w2, b2, w3, b3)

    return out[:B]


def init_params(key, z_dim, N, X_dim):
    """PyTorch-nn.Linear-style init; weights stored [in, out], biases [1, out]."""
    ks = jax.random.split(key, 6)

    def lin(kw, kb, fan_in, fan_out):
        bound = 1.0 / jnp.sqrt(fan_in)
        w = jax.random.uniform(kw, (fan_in, fan_out), jnp.float32, -bound, bound)
        b = jax.random.uniform(kb, (1, fan_out), jnp.float32, -bound, bound)
        return w, b

    w1, b1 = lin(ks[0], ks[1], z_dim, N)
    w2, b2 = lin(ks[2], ks[3], N, N)
    w3, b3 = lin(ks[4], ks[5], N, X_dim)
    return w1, b1, w2, b2, w3, b3


def prepare_params(w1, b1, w2, b2, w3, b3, train=True, mxu_dtype=jnp.bfloat16):
    """Fold the inverted-dropout 1/(1-p) rescale into w2/w3 (train mode) and
    cast weights to bf16 for the MXU; biases stay f32."""
    if train:
        s = jnp.float32(1.0 / (1.0 - DROPOUT_P))
        w2 = w2 * s
        w3 = w3 * s
    return (w1.astype(mxu_dtype), b1.astype(jnp.float32),
            w2.astype(mxu_dtype), b2.astype(jnp.float32),
            w3.astype(mxu_dtype), b3.astype(jnp.float32))


if __name__ == "__main__":
    # Small decoder shapes: B=200 (exercises 128-row tiling + padding),
    # z_dim=16, N=32, X_dim=128.
    B, z_dim, N, X_dim = 200, 16, 32, 128

    key = jax.random.PRNGKey(0)
    k_x, k_p, k_d = jax.random.split(key, 3)
    x = jax.random.normal(k_x, (B, z_dim), jnp.float32)
    raw_params = init_params(k_p, z_dim, N, X_dim)
    params = prepare_params(*raw_params, train=True)

    out = p_net_forward(x, params, k_d, train=True, tile_b=128)
    out = jax.block_until_ready(out)

    assert out.shape == (B, X_dim)
    assert bool(jnp.all(jnp.isfinite(out)))
    assert bool(jnp.all(out >= 0.0)) and bool(jnp.all(out <= 1.0))
    print("KERNEL_OK")
</pallas_src>

<mosaic_0001>
module attributes {stable_mosaic.version = 11 : i64} {
  func.func @p_net_kernel(%arg0: i32, %arg1: memref<128x16xbf16, #tpu.memory_space<vmem>>, %arg2: memref<128x32xi32, #tpu.memory_space<vmem>>, %arg3: memref<128x32xi32, #tpu.memory_space<vmem>>, %arg4: memref<16x32xbf16, #tpu.memory_space<vmem>>, %arg5: memref<1x32xf32, #tpu.memory_space<vmem>>, %arg6: memref<32x32xbf16, #tpu.memory_space<vmem>>, %arg7: memref<1x32xf32, #tpu.memory_space<vmem>>, %arg8: memref<32x128xbf16, #tpu.memory_space<vmem>>, %arg9: memref<1x128xf32, #tpu.memory_space<vmem>>, %arg10: memref<128x128xf32, #tpu.memory_space<vmem>>) attributes {dimension_semantics = [#tpu.dimension_semantics<parallel>], iteration_bounds = array<i64: 2>, scalar_prefetch = 0 : i64, scratch_operands = 0 : i64, tpu.core_type = #tpu.core_type<tc>, window_params = [{transform_indices = @transform_0, window_bounds = array<i64: 128, 16>}, {transform_indices = @transform_1, window_bounds = array<i64: 128, 32>}, {transform_indices = @transform_2, window_bounds = array<i64: 128, 32>}, {pipeline_mode = #tpu.pipeline_mode<synchronous>, transform_indices = @transform_3, window_bounds = array<i64: 16, 32>}, {pipeline_mode = #tpu.pipeline_mode<synchronous>, transform_indices = @transform_4, window_bounds = array<i64: 1, 32>}, {pipeline_mode = #tpu.pipeline_mode<synchronous>, transform_indices = @transform_5, window_bounds = array<i64: 32, 32>}, {pipeline_mode = #tpu.pipeline_mode<synchronous>, transform_indices = @transform_6, window_bounds = array<i64: 1, 32>}, {pipeline_mode = #tpu.pipeline_mode<synchronous>, transform_indices = @transform_7, window_bounds = array<i64: 32, 128>}, {pipeline_mode = #tpu.pipeline_mode<synchronous>, transform_indices = @transform_8, window_bounds = array<i64: 1, 128>}, {transform_indices = @transform_9, window_bounds = array<i64: 128, 128>}]} {
    %c0 = arith.constant 0 : index
    %c0_0 = arith.constant 0 : index
    %0 = vector.load %arg1[%c0, %c0_0] : memref<128x16xbf16, #tpu.memory_space<vmem>>, vector<128x16xbf16>
    %c0_1 = arith.constant 0 : index
    %c0_2 = arith.constant 0 : index
    %1 = vector.load %arg4[%c0_1, %c0_2] : memref<16x32xbf16, #tpu.memory_space<vmem>>, vector<16x32xbf16>
    %cst = arith.constant dense<0.000000e+00> : vector<128x32xf32>
    %2 = tpu.matmul %0, %1, %cst {dimension_numbers = #tpu.dot_dimension_numbers<[1], [0], [0], [1], [0, 0, 1, 1], [], []>} : vector<128x16xbf16>, vector<16x32xbf16>, vector<128x32xf32> -> vector<128x32xf32>
    %c0_3 = arith.constant 0 : index
    %c0_4 = arith.constant 0 : index
    %3 = vector.load %arg5[%c0_3, %c0_4] : memref<1x32xf32, #tpu.memory_space<vmem>>, vector<1x32xf32>
    %4 = vector.broadcast %3 : vector<1x32xf32> to vector<128x32xf32>
    %5 = arith.addf %2, %4 : vector<128x32xf32>
    %c0_5 = arith.constant 0 : index
    %c0_6 = arith.constant 0 : index
    %6 = vector.load %arg2[%c0_5, %c0_6] : memref<128x32xi32, #tpu.memory_space<vmem>>, vector<128x32xi32>
    %c1073741824_i32 = arith.constant 1073741824 : i32
    %7 = vector.broadcast %c1073741824_i32 : i32 to vector<128x32xi32>
    %8 = arith.cmpi slt, %6, %7 : vector<128x32xi32>
    %cst_7 = arith.constant 0.000000e+00 : f32
    %9 = vector.broadcast %cst_7 : f32 to vector<128x32xf32>
    %10 = arith.select %8, %5, %9 : vector<128x32xi1>, vector<128x32xf32>
    %cst_8 = arith.constant 0.000000e+00 : f32
    %11 = vector.broadcast %cst_8 : f32 to vector<128x32xf32>
    %12 = arith.maximumf %10, %11 : vector<128x32xf32>
    %13 = arith.truncf %12 : vector<128x32xf32> to vector<128x32xbf16>
    %c0_9 = arith.constant 0 : index
    %c0_10 = arith.constant 0 : index
    %14 = vector.load %arg6[%c0_9, %c0_10] : memref<32x32xbf16, #tpu.memory_space<vmem>>, vector<32x32xbf16>
    %cst_11 = arith.constant dense<0.000000e+00> : vector<128x32xf32>
    %15 = tpu.matmul %13, %14, %cst_11 {dimension_numbers = #tpu.dot_dimension_numbers<[1], [0], [0], [1], [0, 0, 1, 1], [], []>} : vector<128x32xbf16>, vector<32x32xbf16>, vector<128x32xf32> -> vector<128x32xf32>
    %c0_12 = arith.constant 0 : index
    %c0_13 = arith.constant 0 : index
    %16 = vector.load %arg7[%c0_12, %c0_13] : memref<1x32xf32, #tpu.memory_space<vmem>>, vector<1x32xf32>
    %17 = vector.broadcast %16 : vector<1x32xf32> to vector<128x32xf32>
    %18 = arith.addf %15, %17 : vector<128x32xf32>
    %c0_14 = arith.constant 0 : index
    %c0_15 = arith.constant 0 : index
    %19 = vector.load %arg3[%c0_14, %c0_15] : memref<128x32xi32, #tpu.memory_space<vmem>>, vector<128x32xi32>
    %c1073741824_i32_16 = arith.constant 1073741824 : i32
    %20 = vector.broadcast %c1073741824_i32_16 : i32 to vector<128x32xi32>
    %21 = arith.cmpi slt, %19, %20 : vector<128x32xi32>
    %cst_17 = arith.constant 0.000000e+00 : f32
    %22 = vector.broadcast %cst_17 : f32 to vector<128x32xf32>
    %23 = arith.select %21, %18, %22 : vector<128x32xi1>, vector<128x32xf32>
    %24 = arith.truncf %23 : vector<128x32xf32> to vector<128x32xbf16>
    %c0_18 = arith.constant 0 : index
    %c0_19 = arith.constant 0 : index
    %25 = vector.load %arg8[%c0_18, %c0_19] : memref<32x128xbf16, #tpu.memory_space<vmem>>, vector<32x128xbf16>
    %cst_20 = arith.constant dense<0.000000e+00> : vector<128x128xf32>
    %26 = tpu.matmul %24, %25, %cst_20 {dimension_numbers = #tpu.dot_dimension_numbers<[1], [0], [0], [1], [0, 0, 1, 1], [], []>} : vector<128x32xbf16>, vector<32x128xbf16>, vector<128x128xf32> -> vector<128x128xf32>
    %c0_21 = arith.constant 0 : index
    %c0_22 = arith.constant 0 : index
    %27 = vector.load %arg9[%c0_21, %c0_22] : memref<1x128xf32, #tpu.memory_space<vmem>>, vector<1x128xf32>
    %28 = vector.broadcast %27 : vector<1x128xf32> to vector<128x128xf32>
    %29 = arith.addf %26, %28 : vector<128x128xf32>
    %cst_23 = arith.constant 0.000000e+00 : f32
    %30 = vector.broadcast %cst_23 : f32 to vector<128x128xf32>
    %31 = arith.subf %30, %29 : vector<128x128xf32>
    %32 = math.exp %31 : vector<128x128xf32>
    %cst_24 = arith.constant 1.000000e+00 : f32
    %33 = vector.broadcast %cst_24 : f32 to vector<128x128xf32>
    %34 = arith.addf %33, %32 : vector<128x128xf32>
    %cst_25 = arith.constant 1.000000e+00 : f32
    %35 = vector.broadcast %cst_25 : f32 to vector<128x128xf32>
    %36 = arith.divf %35, %34 : vector<128x128xf32>
    %c0_26 = arith.constant 0 : index
    %c0_27 = arith.constant 0 : index
    %37 = vector.load %arg10[%c0_26, %c0_27] : memref<128x128xf32, #tpu.memory_space<vmem>>, vector<128x128xf32>
    tpu.vector_store %arg10[%c0_26, %c0_27], %36 {strides = array<i32>} : memref<128x128xf32, #tpu.memory_space<vmem>>, vector<128x128xf32>,
    return
  }
  func.func @transform_0(%arg0: i32) -> (i32, i32) {
    %c0_i32 = arith.constant 0 : i32
    %c0_i32_0 = arith.constant 0 : i32
    return %arg0, %c0_i32 : i32, i32
  }
  func.func @transform_1(%arg0: i32) -> (i32, i32) {
    %c0_i32 = arith.constant 0 : i32
    %c0_i32_0 = arith.constant 0 : i32
    return %arg0, %c0_i32 : i32, i32
  }
  func.func @transform_2(%arg0: i32) -> (i32, i32) {
    %c0_i32 = arith.constant 0 : i32
    %c0_i32_0 = arith.constant 0 : i32
    return %arg0, %c0_i32 : i32, i32
  }
  func.func @transform_3(%arg0: i32) -> (i32, i32) {
    %c0_i32 = arith.constant 0 : i32
    %c0_i32_0 = arith.constant 0 : i32
    %c0_i32_1 = arith.constant 0 : i32
    return %c0_i32, %c0_i32_0 : i32, i32
  }
  func.func @transform_4(%arg0: i32) -> (i32, i32) {
    %c0_i32 = arith.constant 0 : i32
    %c0_i32_0 = arith.constant 0 : i32
    %c0_i32_1 = arith.constant 0 : i32
    return %c0_i32, %c0_i32_0 : i32, i32
  }
  func.func @transform_5(%arg0: i32) -> (i32, i32) {
    %c0_i32 = arith.constant 0 : i32
    %c0_i32_0 = arith.constant 0 : i32
    %c0_i32_1 = arith.constant 0 : i32
    return %c0_i32, %c0_i32_0 : i32, i32
  }
  func.func @transform_6(%arg0: i32) -> (i32, i32) {
    %c0_i32 = arith.constant 0 : i32
    %c0_i32_0 = arith.constant 0 : i32
    %c0_i32_1 = arith.constant 0 : i32
    return %c0_i32, %c0_i32_0 : i32, i32
  }
  func.func @transform_7(%arg0: i32) -> (i32, i32) {
    %c0_i32 = arith.constant 0 : i32
    %c0_i32_0 = arith.constant 0 : i32
    %c0_i32_1 = arith.constant 0 : i32
    return %c0_i32, %c0_i32_0 : i32, i32
  }
  func.func @transform_8(%arg0: i32) -> (i32, i32) {
    %c0_i32 = arith.constant 0 : i32
    %c0_i32_0 = arith.constant 0 : i32
    %c0_i32_1 = arith.constant 0 : i32
    return %c0_i32, %c0_i32_0 : i32, i32
  }
  func.func @transform_9(%arg0: i32) -> (i32, i32) {
    %c0_i32 = arith.constant 0 : i32
    %c0_i32_0 = arith.constant 0 : i32
    return %arg0, %c0_i32 : i32, i32
  }
}

</mosaic_0001>

<bundles_post_ra>
// kernel: p_net_forward.7
= control target key start
LH: loop header
LB: loop body
LE: loop exit
PB: predicated region body
PF: predicated region fallthrough
CT: control target
= control target key end

     0   :  { %s1470_s30 = smov 0   ;;  %s1685_s0 = inlined_call_operand.vmem [shape: bf16[256,16], index: 0, kind: input, shape index: {}]   ;;  %s1686_s1 = inlined_call_operand.vmem [shape: s32[256,32], index: 1, kind: input, shape index: {}]   ;;  %s1687_s2 = inlined_call_operand.vmem [shape: s32[256,32], index: 2, kind: input, shape index: {}]   ;;  %s1688_s3 = inlined_call_operand.vmem [shape: bf16[16,32], index: 3, kind: input, shape index: {}]   ;;  %s1689_s4 = inlined_call_operand.vmem [shape: f32[1,32], index: 4, kind: input, shape index: {}]   ;;  %s1690_s5 = inlined_call_operand.vmem [shape: bf16[32,32], index: 5, kind: input, shape index: {}]   ;;  %s1691_s6 = inlined_call_operand.vmem [shape: f32[1,32], index: 6, kind: input, shape index: {}]   ;;  %s1692_s7 = inlined_call_operand.vmem [shape: bf16[32,128], index: 7, kind: input, shape index: {}]   ;;  %s1693_s8 = inlined_call_operand.vmem [shape: f32[1,128], index: 8, kind: input, shape index: {}]   ;;  %s1694_s9 = inlined_call_operand.vmem [shape: f32[256,128], index: 9, kind: output, shape index: {}]  }
   0x1 LB: > { %s1183_s10 = sadd.s32 4294967295, %s1418_s30   ;;  %p1187_p0 = scmp.ge.s32.totalorder %s1418_s30, 1  ;;  %s1418_s30 = sphi %s1470_s30, %s19_s30  }
   0x2   : > { %p310_p1 = scmp.lt.s32.totalorder %s1418_s30, 3 }
   0x4   : > { %p311_p2 = pnand %p1187_p0, %p310_p1 }
   0x5   : > { %v1335_v0 = vld [vmem:[%s1688_s3] sm:$0xff] (!%p311_p2)   ;;  %s1188_s13 = sshll.u32 (!%p311_p2), %s1183_s10, 4  ;;  %vm452_vm0 = vcmask (!%p311_p2), 130048   ;;  %v1345_v10 = vld [vmem:[%s1690_s5 + $0x8] sm:$0xff] (!%p311_p2)   ;;  %vm669_vm7 = vcmask (!%p311_p2), 261120  }
   0x6   : > { %314 = sbr.rel (%p311_p2) target bundleno = 733 (0x2dd), region = 56  ;;  %p357_p3 = scmp.lt.s32.totalorder (!%p311_p2), %s1188_s13, 31  ;;  %1267 = vmatprep.subr.bf16.mxu0 (!%p311_p2), %v1335_v0  ;;  %1325 = vmatprep.subr.bf16.mxu1 (!%p311_p2), %v1335_v0  ;;  %v1344_v1 = vld [vmem:[%s1690_s5] sm:$0xff] (!%p311_p2)  }
   0x7   : > { %1268 = vmatpush3.bf16.msra.mxu0 (!%p311_p2), %v1335_v0  ;;  %1326 = vmatpush3.bf16.msra.mxu1 (!%p311_p2), %v1335_v0  ;;  %v1346_v11 = vld [vmem:[%s1692_s7] sm:$0xff] (!%p311_p2)  }
   0x8   : > { %1285 = vmatprep.subr.bf16.mxu1 (!%p311_p2), %v1344_v1  ;;  %1305 = vmatprep.subr.bf16.mxu0 (!%p311_p2), %v1346_v11  ;;  %v1512_v12 = vld [vmem:[%s1689_s4] ss:$0 sm:$0xff] (!%p311_p2) }
   0xd   : > { %s1696_s13 = smov (!%p357_p3, %s1188_s13), 31 }
   0xe   : > { %s1189_s16 = sshll.u32 %s1696_s13, 2  ;;  %s1501_s24 = sshll.u32 %s1696_s13, 3 }
   0xf   : > { %s360_s19 = scalar_lea.vmem %s1685_s0, %s1189_s16  ;;  %s1507_s27 = scalar_lea.vmem %s1686_s1, %s1501_s24 }
  0x10   : > { %v1336_v2 = vld [vmem:[%s360_s19] sm:$0xff]   ;;  %v1337_v3 = vld [vmem:[%s360_s19 + $0x8] sm:$0xff]   ;;  %v1338_v4 = vld [vmem:[%s360_s19 + $0x10] sm:$0xff]   ;;  %s1592_s14 = scalar_lea.vmem %s1687_s2, %s1501_s24  ;;  %s1663_s21 = scalar_lea.vmem %s1694_s9, %s1501_s24 }
  0x11   : > { %1269 = vmatprep.mubr.msk.bf16.mxu0 %vm452_vm0, %v1336_v2  ;;  %v1340_v5 = vld [vmem:[%s360_s19 + $0x20] sm:$0xff]   ;;  %v1341_v6 = vld [vmem:[%s360_s19 + $0x28] sm:$0xff]   ;;  %v1342_v7 = vld [vmem:[%s360_s19 + $0x30] sm:$0xff]  }
  0x12   : > { %1270 = vmatmul.mubr.msk.bf16.vlgmr.msra.gmra.mrb[0].mxu0 %vm452_vm0, %v1337_v3  ;;  %1277 = vmatprep.mubr.msk.bf16.mxu1 %vm452_vm0, %v1340_v5  ;;  %v1339_v8 = vld [vmem:[%s360_s19 + $0x18] sm:$0xff]   ;;  %v576_v13 = vld [vmem:[%s1507_s27 + $0x10] sm:$0xff]  ;;  %v574_v14 = vld [vmem:[%s1507_s27] sm:$0xff] }
  0x13   : > { %1273 = vmatprep.mubr.msk.bf16.mxu0 %vm452_vm0, %v1338_v4  ;;  %1278 = vmatmul.mubr.msk.bf16.vlgmr.msra.gmra.mrb[0].mxu1 %vm452_vm0, %v1341_v6  ;;  %v1343_v9 = vld [vmem:[%s360_s19 + $0x38] sm:$0xff]   ;;  %v575_v16 = vld [vmem:[%s1507_s27 + $0x8] sm:$0xff]  ;;  %v1519_v17 = vld [vmem:[%s1507_s27 + $0x30] sm:$0xff]  ;;  %vm592_vm1 = vcmp.lt.s32.totalorder %v576_v13, 1073741824  ;;  %vm590_vm2 = vcmp.lt.s32.totalorder %v574_v14, 1073741824 }
  0x14   : > { %1281 = vmatprep.mubr.msk.bf16.mxu1 %vm452_vm0, %v1342_v7  ;;  %1286 = vmatpush3.bf16.msra.mxu1 %v1344_v1  ;;  %v577_v15 = vld [vmem:[%s1507_s27 + $0x18] sm:$0xff]  ;;  %v1522_v18 = vld [vmem:[%s1507_s27 + $0x20] sm:$0xff]  ;;  %v1528_v21 = vld [vmem:[%s1507_s27 + $0x28] sm:$0xff]  ;;  %vm591_vm4 = vcmp.lt.s32.totalorder %v575_v16, 1073741824  ;;  %vm596_vm5 = vcmp.lt.s32.totalorder %v1519_v17, 1073741824 }
  0x15   : > { %1287 = vmatprep.subr.bf16.mxu1 %v1345_v10  ;;  %1306 = vmatpush3.bf16.msra.mxu0 %v1346_v11  ;;  %v1525_v20 = vld [vmem:[%s1507_s27 + $0x38] sm:$0xff]  ;;  %vm593_vm3 = vcmp.lt.s32.totalorder %v577_v15, 1073741824  ;;  %v584_v24 = vld [vmem:[%s1507_s27 + $0x50] sm:$0xff]  ;;  %v582_v25 = vld [vmem:[%s1507_s27 + $0x40] sm:$0xff]  ;;  %vm594_vm6 = vcmp.lt.s32.totalorder %v1522_v18, 1073741824  ;;  %vm595_vm9 = vcmp.lt.s32.totalorder %v1528_v21, 1073741824 }
  0x16   : > { %v585_v28 = vld [vmem:[%s1507_s27 + $0x58] sm:$0xff]  ;;  %v583_v29 = vld [vmem:[%s1507_s27 + $0x48] sm:$0xff]  ;;  %vm597_vm8 = vcmp.lt.s32.totalorder %v1525_v20, 1073741824  ;;  %vm600_vm10 = vcmp.lt.s32.totalorder %v584_v24, 1073741824  ;;  %vm598_vm11 = vcmp.lt.s32.totalorder %v582_v25, 1073741824  ;;  %v588_v49 = vld [vmem:[%s1507_s27 + $0x70] sm:$0xff] }
  0x17   : > { %vm601_vm12 = vcmp.lt.s32.totalorder %v585_v28, 1073741824  ;;  %vm599_vm13 = vcmp.lt.s32.totalorder %v583_v29, 1073741824  ;;  %v586_v55 = vld [vmem:[%s1507_s27 + $0x60] sm:$0xff]  ;;  %v589_v61 = vld [vmem:[%s1507_s27 + $0x78] sm:$0xff]  ;;  %vm604_vm14 = vcmp.lt.s32.totalorder %v588_v49, 1073741824  ;;  %v587_v2 = vld [vmem:[%s1507_s27 + $0x68] sm:$0xff] }
  0x18   : > { %1288 = vmatpush3.bf16.msra.mxu1 %v1345_v10  ;;  %vm602_vm15 = vcmp.lt.s32.totalorder %v586_v55, 1073741824 }
  0x1a   : > { %1274 = vmatmul.mubr.msk.bf16.gmra.mrb[4].mxu0 %vm452_vm0, %v1339_v8 }
  0x1b   : > { %1282 = vmatmul.mubr.msk.bf16.gmra.mrb[4].mxu1 %vm452_vm0, %v1343_v9  ;;  %vm605_vm0 = vcmp.lt.s32.totalorder %v589_v61, 1073741824  ;;  %v796_v61 = vld [vmem:[%s1592_s14 + $0x28] sm:$0xff] }
  0xe5   : > { %v1271_v19 = vpop.f32.mrb[0].mxu0 }
  0xe6   : > { %v520_v22 = vadd.f32 %v1271_v19, %v1512_v12  ;;  %v511_v23 = vpop.f32.mrb[1].mxu0  ;;  %v1279_v35 = vpop.f32.mrb[0].mxu1 }
  0xe7   : > { %v512_v26 = vadd.f32 %v1512_v12, %v511_v23  ;;  %v1272_v27 = vpop.f32.mrb[2].mxu0  ;;  %v552_v37 = vadd.f32 %v1279_v35, %v1512_v12  ;;  %v543_v38 = vpop.f32.mrb[1].mxu1 }
  0xe8   : > { %v608_v30 = vsel %vm592_vm1, %v520_v22, 0.0  ;;  %v523_v31 = vadd.f32 %v1272_v27, %v1512_v12  ;;  %v514_v32 = vpop.f32.mrb[3].mxu0  ;;  %v544_v42 = vadd.f32 %v1512_v12, %v543_v38  ;;  %v1280_v43 = vpop.f32.mrb[2].mxu1  ;;  %vm603_vm1 = vcmp.lt.s32.totalorder %v587_v2, 1073741824  ;;  %v1597_v38 = vld [vmem:[%s1691_s6] ss:$0 sm:$0xff] }
  0xe9   : > { %v606_v33 = vsel %vm590_vm2, %v512_v26, 0.0  ;;  %v515_v34 = vadd.f32 %v1512_v12, %v514_v32  ;;  %v624_v39 = vmax.f32 %v608_v30, 0.0  ;;  %v616_v46 = vsel %vm600_vm10, %v552_v37, 0.0  ;;  %v546_v48 = vpop.f32.mrb[3].mxu1 }
  0xea   : > { %v609_v36 = vsel %vm593_vm3, %v523_v31, 0.0  ;;  %v622_v44 = vmax.f32 %v606_v33, 0.0  ;;  %v555_v47 = vadd.f32 %v1280_v43, %v1512_v12  ;;  %v632_v52 = vmax.f32 %v616_v46, 0.0  ;;  %v792_v43 = vld [vmem:[%s1592_s14 + $0x8] sm:$0xff] }
  0xeb   : > { %v625_v40 = vmax.f32 %v609_v36, 0.0  ;;  %v607_v41 = vsel %vm591_vm4, %v515_v34, 0.0  ;;  %v614_v53 = vsel %vm598_vm11, %v544_v42, 0.0  ;;  %v547_v54 = vadd.f32 %v1512_v12, %v546_v48  ;;  %v791_v42 = vld [vmem:[%s1592_s14] sm:$0xff] }
  0xec   : > { %v623_v45 = vmax.f32 %v607_v41, 0.0  ;;  %v630_v59 = vmax.f32 %v614_v53, 0.0  ;;  %v617_v60 = vsel %vm601_vm12, %v555_v47, 0.0  ;;  %vm807_vm4 = vcmp.lt.s32.totalorder %v791_v42, 1073741824 }
  0xed   : > { %v639_v50 = vpack.c.bf16 %v625_v40, %v624_v39  ;;  %v1275_v51 = vpop.f32.mrb[4].mxu0  ;;  %v633_v0 = vmax.f32 %v617_v60, 0.0  ;;  %v615_v1 = vsel %vm599_vm13, %v547_v54, 0.0  ;;  %v793_v39 = vld [vmem:[%s1592_s14 + $0x10] sm:$0xff]  ;;  %v794_v40 = vld [vmem:[%s1592_s14 + $0x18] sm:$0xff]  ;;  %v795_v60 = vld [vmem:[%s1592_s14 + $0x20] sm:$0xff] }
  0xee   : > { %v638_v56 = vpack.c.bf16 %v623_v45, %v622_v44  ;;  %v536_v57 = vadd.f32 %v1275_v51, %v1512_v12  ;;  %v527_v58 = vpop.f32.mrb[5].mxu0  ;;  %v631_v6 = vmax.f32 %v615_v1, 0.0  ;;  %v1283_v10 = vpop.f32.mrb[4].mxu1  ;;  %vm809_vm2 = vcmp.lt.s32.totalorder %v793_v39, 1073741824 }
  0xef   : > { %v528_v62 = vadd.f32 %v1512_v12, %v527_v58  ;;  %v1276_v63 = vpop.f32.mrb[6].mxu0  ;;  %v643_v9 = vpack.c.bf16 %v633_v0, %v632_v52  ;;  %v568_v14 = vadd.f32 %v1283_v10, %v1512_v12  ;;  %v559_v15 = vpop.f32.mrb[5].mxu1  ;;  %vm810_vm3 = vcmp.lt.s32.totalorder %v794_v40, 1073741824  ;;  %v798_v58 = vld [vmem:[%s1592_s14 + $0x38] sm:$0xff] }
  0xf0   : > { %v612_v3 = vsel %vm596_vm5, %v536_v57, 0.0  ;;  %v539_v4 = vadd.f32 %v1276_v63, %v1512_v12  ;;  %v530_v5 = vpop.f32.mrb[7].mxu0  ;;  %1289 = vmatprep.mubr.msk.bf16.mxu1 %vm669_vm7, %v638_v56  ;;  %v642_v13 = vpack.c.bf16 %v631_v6, %v630_v59  ;;  %v560_v19 = vadd.f32 %v1512_v12, %v559_v15  ;;  %v1284_v22 = vpop.f32.mrb[6].mxu1  ;;  %v797_v57 = vld [vmem:[%s1592_s14 + $0x30] sm:$0xff]  ;;  %v799_v15 = vld [vmem:[%s1592_s14 + $0x40] sm:$0xff] }
  0xf1   : > { %v610_v7 = vsel %vm594_vm6, %v528_v62, 0.0  ;;  %v531_v8 = vadd.f32 %v1512_v12, %v530_v5  ;;  %1290 = vmatmul.mubr.msk.bf16.vlgmr.msra.gmra.mrb[8].mxu1 %vm669_vm7, %v639_v50  ;;  %v628_v16 = vmax.f32 %v612_v3, 0.0  ;;  %v620_v25 = vsel %vm604_vm14, %v568_v14, 0.0  ;;  %v562_v26 = vpop.f32.mrb[7].mxu1 }
  0xf2   : > { %v613_v11 = vsel %vm597_vm8, %v539_v4, 0.0  ;;  %v626_v23 = vmax.f32 %v610_v7, 0.0  ;;  %v571_v20 = vadd.f32 %v1284_v22, %v1512_v12  ;;  %v636_v28 = vmax.f32 %v620_v25, 0.0 }
  0xf3   : > { %v629_v17 = vmax.f32 %v613_v11, 0.0  ;;  %v611_v18 = vsel %vm595_vm9, %v531_v8, 0.0  ;;  %v618_v29 = vsel %vm602_vm15, %v560_v19, 0.0  ;;  %v563_v30 = vadd.f32 %v1512_v12, %v562_v26  ;;  %v1347_v12 = vld [vmem:[%s1692_s7 + $0x8] sm:$0xff]   ;;  %v801_v11 = vld [vmem:[%s1592_s14 + $0x50] sm:$0xff] }
  0xf4   : > { %v627_v24 = vmax.f32 %v611_v18, 0.0  ;;  %v634_v32 = vmax.f32 %v618_v29, 0.0  ;;  %v621_v21 = vsel %vm605_vm0, %v571_v20, 0.0  ;;  %1307 = vmatprep.subr.bf16.mxu0 %v1347_v12  ;;  %vm808_vm5 = vcmp.lt.s32.totalorder %v792_v43, 1073741824 }
  0xf5   : > { %v641_v27 = vpack.c.bf16 %v629_v17, %v628_v16  ;;  %v637_v33 = vmax.f32 %v621_v21, 0.0  ;;  %v619_v34 = vsel %vm603_vm1, %v563_v30, 0.0  ;;  %1308 = vmatpush3.bf16.msra.mxu0 %v1347_v12  ;;  %vm813_vm6 = vcmp.lt.s32.totalorder %v797_v57, 1073741824  ;;  %v800_v16 = vld [vmem:[%s1592_s14 + $0x48] sm:$0xff] }
  0xf6   : > { %v640_v31 = vpack.c.bf16 %v627_v24, %v626_v23  ;;  %v635_v35 = vmax.f32 %v619_v34, 0.0  ;;  %vm814_vm8 = vcmp.lt.s32.totalorder %v798_v58, 1073741824  ;;  %vm811_vm9 = vcmp.lt.s32.totalorder %v795_v60, 1073741824  ;;  %v804_v34 = vld [vmem:[%s1592_s14 + $0x68] sm:$0xff] }
  0xf7   : > { %v645_v36 = vpack.c.bf16 %v637_v33, %v636_v28  ;;  %vm812_vm10 = vcmp.lt.s32.totalorder %v796_v61, 1073741824  ;;  %vm817_vm11 = vcmp.lt.s32.totalorder %v801_v11, 1073741824  ;;  %vm815_vm13 = vcmp.lt.s32.totalorder %v799_v15, 1073741824  ;;  %v803_v33 = vld [vmem:[%s1592_s14 + $0x60] sm:$0xff] }
  0xf8   : > { %1293 = vmatprep.mubr.msk.bf16.mxu1 %vm669_vm7, %v640_v31  ;;  %v644_v37 = vpack.c.bf16 %v635_v35, %v634_v32  ;;  %vm816_vm14 = vcmp.lt.s32.totalorder %v800_v16, 1073741824  ;;  %v805_v31 = vld [vmem:[%s1592_s14 + $0x70] sm:$0xff]  ;;  %v806_v32 = vld [vmem:[%s1592_s14 + $0x78] sm:$0xff]  ;;  %vm819_vm1 = vcmp.lt.s32.totalorder %v803_v33, 1073741824 }
  0xf9   : > { %1294 = vmatmul.mubr.msk.bf16.gmra.mrb[12].mxu1 %vm669_vm7, %v641_v27  ;;  %vm821_vm15 = vcmp.lt.s32.totalorder %v805_v31, 1073741824  ;;  %vm822_vm0 = vcmp.lt.s32.totalorder %v806_v32, 1073741824 }
  0xfa   : > { %1297 = vmatprep.mubr.msk.bf16.mxu1 %vm669_vm7, %v642_v13  ;;  %v802_v13 = vld [vmem:[%s1592_s14 + $0x58] sm:$0xff] }
  0xfb   : > { %vm818_vm12 = vcmp.lt.s32.totalorder %v802_v13, 1073741824 }
 0x101   : > { %1298 = vmatmul.mubr.msk.bf16.gmra.mrb[16].mxu1 %vm669_vm7, %v643_v9 }
 0x102   : > { %1301 = vmatprep.mubr.msk.bf16.mxu1 %vm669_vm7, %v644_v37 }
 0x109   : > { %1302 = vmatmul.mubr.msk.bf16.gmra.mrb[20].mxu1 %vm669_vm7, %v645_v36 }
 0x1c4   : > { %v1291_v41 = vpop.f32.mrb[8].mxu1 }
 0x1c5   : > { %v737_v44 = vadd.f32 %v1291_v41, %v1597_v38  ;;  %v728_v45 = vpop.f32.mrb[9].mxu1 }
 0x1c6   : > { %v729_v46 = vadd.f32 %v1597_v38, %v728_v45  ;;  %v1292_v47 = vpop.f32.mrb[10].mxu1 }
 0x1c7   : > { %v740_v48 = vadd.f32 %v1292_v47, %v1597_v38  ;;  %v731_v49 = vpop.f32.mrb[11].mxu1  ;;  %v825_v51 = vsel %vm809_vm2, %v737_v44, 0.0  ;;  %vm820_vm2 = vcmp.lt.s32.totalorder %v804_v34, 1073741824 }
 0x1c8   : > { %v732_v50 = vadd.f32 %v1597_v38, %v731_v49  ;;  %v823_v53 = vsel %vm807_vm4, %v729_v46, 0.0 }
 0x1c9   : > { %v826_v52 = vsel %vm810_vm3, %v740_v48, 0.0  ;;  %v1642_v48 = vld [vmem:[%s1693_s8] ss:$0 sm:$0xff] }
 0x1ca   : > { %v840_v54 = vpack.c.bf16 %v826_v52, %v825_v51  ;;  %v824_v55 = vsel %vm808_vm5, %v732_v50, 0.0 }
 0x1cb   : > { %v839_v56 = vpack.c.bf16 %v824_v55, %v823_v53 }
 0x1cc   : > { %v1295_v59 = vpop.f32.mrb[12].mxu1 }
 0x1cd   : > { %v753_v62 = vadd.f32 %v1295_v59, %v1597_v38  ;;  %v744_v63 = vpop.f32.mrb[13].mxu1  ;;  %1309 = vmatprep.mubr.msk.bf16.mxu0 %vm669_vm7, %v839_v56 }
 0x1ce   : > { %v745_v0 = vadd.f32 %v1597_v38, %v744_v63  ;;  %v1296_v1 = vpop.f32.mrb[14].mxu1  ;;  %1310 = vmatmul.mubr.msk.bf16.vlgmr.msra.gmra.mrb[8].mxu0 %vm669_vm7, %v840_v54 }
 0x1cf   : > { %v756_v2 = vadd.f32 %v1296_v1, %v1597_v38  ;;  %v747_v3 = vpop.f32.mrb[15].mxu1  ;;  %v829_v5 = vsel %vm813_vm6, %v753_v62, 0.0 }
 0x1d0   : > { %v748_v4 = vadd.f32 %v1597_v38, %v747_v3  ;;  %v827_v7 = vsel %vm811_vm9, %v745_v0, 0.0 }
 0x1d1   : > { %v830_v6 = vsel %vm814_vm8, %v756_v2, 0.0 }
 0x1d2   : > { %v842_v8 = vpack.c.bf16 %v830_v6, %v829_v5  ;;  %v828_v9 = vsel %vm812_vm10, %v748_v4, 0.0 }
 0x1d3   : > { %v841_v10 = vpack.c.bf16 %v828_v9, %v827_v7 }
 0x1d4   : > { %v1299_v14 = vpop.f32.mrb[16].mxu1 }
 0x1d5   : > { %v769_v17 = vadd.f32 %v1299_v14, %v1597_v38  ;;  %v760_v18 = vpop.f32.mrb[17].mxu1  ;;  %1313 = vmatprep.mubr.msk.bf16.mxu0 %vm669_vm7, %v841_v10 }
 0x1d6   : > { %v761_v19 = vadd.f32 %v1597_v38, %v760_v18  ;;  %v1300_v22 = vpop.f32.mrb[18].mxu1  ;;  %1314 = vmatmul.mubr.msk.bf16.gmra.mrb[12].mxu0 %vm669_vm7, %v842_v8 }
 0x1d7   : > { %v772_v23 = vadd.f32 %v1300_v22, %v1597_v38  ;;  %v763_v24 = vpop.f32.mrb[19].mxu1  ;;  %v833_v20 = vsel %vm817_vm11, %v769_v17, 0.0 }
 0x1d8   : > { %v764_v25 = vadd.f32 %v1597_v38, %v763_v24  ;;  %v831_v27 = vsel %vm815_vm13, %v761_v19, 0.0 }
 0x1d9   : > { %v834_v26 = vsel %vm818_vm12, %v772_v23, 0.0 }
 0x1da   : > { %v844_v28 = vpack.c.bf16 %v834_v26, %v833_v20  ;;  %v832_v29 = vsel %vm816_vm14, %v764_v25, 0.0 }
 0x1db   : > { %v843_v30 = vpack.c.bf16 %v832_v29, %v831_v27 }
 0x1dc   : > { %v1303_v21 = vpop.f32.mrb[20].mxu1 }
 0x1dd   : > { %v785_v35 = vadd.f32 %v1303_v21, %v1597_v38  ;;  %v776_v36 = vpop.f32.mrb[21].mxu1  ;;  %1317 = vmatprep.mubr.msk.bf16.mxu0 %vm669_vm7, %v843_v30 }
 0x1de   : > { %v777_v37 = vadd.f32 %v1597_v38, %v776_v36  ;;  %v1304_v12 = vpop.f32.mrb[22].mxu1  ;;  %1318 = vmatmul.mubr.msk.bf16.gmra.mrb[16].mxu0 %vm669_vm7, %v844_v28 }
 0x1df   : > { %v788_v39 = vadd.f32 %v1304_v12, %v1597_v38  ;;  %v779_v40 = vpop.f32.mrb[23].mxu1  ;;  %v837_v42 = vsel %vm821_vm15, %v785_v35, 0.0 }
 0x1e0   : > { %v780_v41 = vadd.f32 %v1597_v38, %v779_v40  ;;  %v835_v44 = vsel %vm819_vm1, %v777_v37, 0.0 }
 0x1e1   : > { %v838_v43 = vsel %vm822_vm0, %v788_v39, 0.0 }
 0x1e2   : > { %v846_v45 = vpack.c.bf16 %v838_v43, %v837_v42  ;;  %v836_v46 = vsel %vm820_vm2, %v780_v41, 0.0 }
 0x1e3   : > { %v845_v47 = vpack.c.bf16 %v836_v46, %v835_v44 }
 0x1e5   : > { %1321 = vmatprep.mubr.msk.bf16.mxu0 %vm669_vm7, %v845_v47 }
 0x1e6   : > { %1322 = vmatmul.mubr.msk.bf16.gmra.mrb[20].mxu0 %vm669_vm7, %v846_v45 }
 0x2a1   : > { %v1311_v49 = vpop.f32.mrb[8].mxu0 }
 0x2a2   : > { %v937_v50 = vadd.f32 %v1311_v49, %v1642_v48  ;;  %v928_v51 = vpop.f32.mrb[9].mxu0 }
 0x2a3   : > { %v929_v38 = vadd.f32 %v1642_v48, %v928_v51  ;;  %v1312_v52 = vpop.f32.mrb[10].mxu0 }
 0x2a4   : > { %v993_v53 = vsub.f32 0.0, %v937_v50  ;;  %v940_v54 = vadd.f32 %v1312_v52, %v1642_v48  ;;  %v931_v55 = vpop.f32.mrb[11].mxu0 }
 0x2a5   : > { %v991_v56 = vsub.f32 0.0, %v929_v38  ;;  %v932_v57 = vadd.f32 %v1642_v48, %v931_v55 }
 0x2a6   : > { %v1011_v58 = vmul.f32 1.442695, %v993_v53  ;;  %v994_v59 = vsub.f32 0.0, %v940_v54 }
 0x2a7   : > { %v1007_v60 = vmul.f32 1.442695, %v991_v56  ;;  %v992_v61 = vsub.f32 0.0, %v932_v57 }
 0x2a8   : > { %1348 = vpow2.f32 %v1011_v58  ;;  %v1013_v62 = vmul.f32 1.442695, %v994_v59 }
 0x2a9   : > { %1350 = vpow2.f32 %v1007_v60  ;;  %v1009_v63 = vmul.f32 1.442695, %v992_v61  ;;  %v1315_v0 = vpop.f32.mrb[12].mxu0 }
 0x2aa   : > { %1352 = vpow2.f32 %v1013_v62  ;;  %v953_v1 = vadd.f32 %v1315_v0, %v1642_v48  ;;  %v944_v2 = vpop.f32.mrb[13].mxu0 }
 0x2ab   : > { %1354 = vpow2.f32 %v1009_v63  ;;  %v945_v3 = vadd.f32 %v1642_v48, %v944_v2  ;;  %v1316_v4 = vpop.f32.mrb[14].mxu0 }
 0x2ac   : > { %v997_v5 = vsub.f32 0.0, %v953_v1  ;;  %v956_v6 = vadd.f32 %v1316_v4, %v1642_v48  ;;  %v947_v7 = vpop.f32.mrb[15].mxu0 }
 0x2ad   : > { %v995_v8 = vsub.f32 0.0, %v945_v3  ;;  %v948_v9 = vadd.f32 %v1642_v48, %v947_v7 }
 0x2ae   : > { %v1019_v10 = vmul.f32 1.442695, %v997_v5  ;;  %v998_v11 = vsub.f32 0.0, %v956_v6 }
 0x2af   : > { %v1015_v13 = vmul.f32 1.442695, %v995_v8  ;;  %v996_v14 = vsub.f32 0.0, %v948_v9 }
 0x2b0   : > { %1356 = vpow2.f32 %v1019_v10  ;;  %v1021_v15 = vmul.f32 1.442695, %v998_v11 }
 0x2b1   : > { %1358 = vpow2.f32 %v1015_v13  ;;  %v1017_v16 = vmul.f32 1.442695, %v996_v14  ;;  %v1319_v17 = vpop.f32.mrb[16].mxu0 }
 0x2b2   : > { %v1349_v18 = vpop.eup %1348  ;;  %1360 = vpow2.f32 %v1021_v15  ;;  %v969_v19 = vadd.f32 %v1319_v17, %v1642_v48  ;;  %v960_v22 = vpop.f32.mrb[17].mxu0 }
 0x2b3   : > { %v1351_v23 = vpop.eup %1350  ;;  %v1041_v24 = vadd.f32 1.0, %v1349_v18  ;;  %1362 = vpow2.f32 %v1017_v16  ;;  %v961_v25 = vadd.f32 %v1642_v48, %v960_v22  ;;  %v1320_v20 = vpop.f32.mrb[18].mxu0 }
 0x2b4   : > { %v1353_v26 = vpop.eup %1352  ;;  %v1039_v27 = vadd.f32 1.0, %v1351_v23  ;;  %v1001_v28 = vsub.f32 0.0, %v969_v19  ;;  %v972_v29 = vadd.f32 %v1320_v20, %v1642_v48  ;;  %v963_v30 = vpop.f32.mrb[19].mxu0 }
 0x2b5   : > { %v1355_v31 = vpop.eup %1354  ;;  %1364 = vrcp.f32 %v1041_v24  ;;  %v1042_v32 = vadd.f32 1.0, %v1353_v26  ;;  %v999_v21 = vsub.f32 0.0, %v961_v25  ;;  %v964_v33 = vadd.f32 %v1642_v48, %v963_v30 }
 0x2b6   : > { %1366 = vrcp.f32 %v1039_v27  ;;  %v1040_v34 = vadd.f32 1.0, %v1355_v31  ;;  %v1027_v35 = vmul.f32 1.442695, %v1001_v28  ;;  %v1002_v36 = vsub.f32 0.0, %v972_v29 }
 0x2b7   : > { %1368 = vrcp.f32 %v1042_v32  ;;  %v1023_v37 = vmul.f32 1.442695, %v999_v21  ;;  %v1000_v12 = vsub.f32 0.0, %v964_v33 }
 0x2b8   : > { %1370 = vrcp.f32 %v1040_v34  ;;  %v1029_v39 = vmul.f32 1.442695, %v1002_v36 }
 0x2b9   : > { %1372 = vpow2.f32 %v1027_v35  ;;  %v1025_v40 = vmul.f32 1.442695, %v1000_v12  ;;  %v1323_v41 = vpop.f32.mrb[20].mxu0 }
 0x2ba   : > { %v1357_v42 = vpop.eup %1356  ;;  %1374 = vpow2.f32 %v1023_v37  ;;  %v985_v43 = vadd.f32 %v1323_v41, %v1642_v48  ;;  %v976_v44 = vpop.f32.mrb[21].mxu0 }
 0x2bb   : > { %v1359_v45 = vpop.eup %1358  ;;  %v1045_v46 = vadd.f32 1.0, %v1357_v42  ;;  %1376 = vpow2.f32 %v1029_v39  ;;  %v977_v47 = vadd.f32 %v1642_v48, %v976_v44  ;;  %v1324_v49 = vpop.f32.mrb[22].mxu0 }
 0x2bc   : > { %v1361_v50 = vpop.eup %1360  ;;  %v1043_v51 = vadd.f32 1.0, %v1359_v45  ;;  %1378 = vpow2.f32 %v1025_v40  ;;  %v1005_v38 = vsub.f32 0.0, %v985_v43  ;;  %v988_v52 = vadd.f32 %v1324_v49, %v1642_v48  ;;  %v979_v53 = vpop.f32.mrb[23].mxu0 }
 0x2bd   : > { %v1363_v54 = vpop.eup %1362  ;;  %1380 = vrcp.f32 %v1045_v46  ;;  %v1046_v55 = vadd.f32 1.0, %v1361_v50  ;;  %v1003_v56 = vsub.f32 0.0, %v977_v47  ;;  %v980_v57 = vadd.f32 %v1642_v48, %v979_v53 }
 0x2be   : > { %1382 = vrcp.f32 %v1043_v51  ;;  %v1044_v58 = vadd.f32 1.0, %v1363_v54  ;;  %v1035_v59 = vmul.f32 1.442695, %v1005_v38  ;;  %v1006_v60 = vsub.f32 0.0, %v988_v52 }
 0x2bf   : > { %v1365_v61 = vpop.eup %1364  ;;  %1384 = vrcp.f32 %v1046_v55  ;;  %v1031_v62 = vmul.f32 1.442695, %v1003_v56  ;;  %v1004_v63 = vsub.f32 0.0, %v980_v57 }
 0x2c0   : > { %v1367_v0 = vpop.eup %1366  ;;  %1089 = vst [vmem:[%s1663_s21 + $0x10] sm:$0xff] %v1365_v61  ;;  %1386 = vrcp.f32 %v1044_v58  ;;  %v1037_v1 = vmul.f32 1.442695, %v1006_v60 }
 0x2c1   : > { %v1369_v2 = vpop.eup %1368  ;;  %1087 = vst [vmem:[%s1663_s21] sm:$0xff] %v1367_v0  ;;  %1388 = vpow2.f32 %v1035_v59  ;;  %v1033_v3 = vmul.f32 1.442695, %v1004_v63 }
 0x2c2   : > { %v1371_v4 = vpop.eup %1370  ;;  %1090 = vst [vmem:[%s1663_s21 + $0x18] sm:$0xff] %v1369_v2  ;;  %1390 = vpow2.f32 %v1031_v62 }
 0x2c3   : > { %v1373_v48 = vpop.eup %1372  ;;  %1088 = vst [vmem:[%s1663_s21 + $0x8] sm:$0xff] %v1371_v4  ;;  %1392 = vpow2.f32 %v1037_v1 }
 0x2c4   : > { %v1375_v5 = vpop.eup %1374  ;;  %v1049_v6 = vadd.f32 1.0, %v1373_v48  ;;  %1394 = vpow2.f32 %v1033_v3 }
 0x2c5   : > { %v1377_v7 = vpop.eup %1376  ;;  %v1047_v8 = vadd.f32 1.0, %v1375_v5 }
 0x2c6   : > { %v1379_v9 = vpop.eup %1378  ;;  %1396 = vrcp.f32 %v1049_v6  ;;  %v1050_v10 = vadd.f32 1.0, %v1377_v7 }
 0x2c7   : > { %v1381_v11 = vpop.eup %1380  ;;  %1398 = vrcp.f32 %v1047_v8  ;;  %v1048_v13 = vadd.f32 1.0, %v1379_v9 }
 0x2c8   : > { %v1383_v14 = vpop.eup %1382  ;;  %1093 = vst [vmem:[%s1663_s21 + $0x30] sm:$0xff] %v1381_v11  ;;  %1400 = vrcp.f32 %v1050_v10 }
 0x2c9   : > { %v1385_v15 = vpop.eup %1384  ;;  %1091 = vst [vmem:[%s1663_s21 + $0x20] sm:$0xff] %v1383_v14  ;;  %1402 = vrcp.f32 %v1048_v13 }
 0x2ca   : > { %v1387_v16 = vpop.eup %1386  ;;  %1094 = vst [vmem:[%s1663_s21 + $0x38] sm:$0xff] %v1385_v15 }
 0x2cb   : > { %v1389_v17 = vpop.eup %1388  ;;  %1092 = vst [vmem:[%s1663_s21 + $0x28] sm:$0xff] %v1387_v16 }
 0x2cc   : > { %v1391_v18 = vpop.eup %1390  ;;  %v1053_v19 = vadd.f32 1.0, %v1389_v17 }
 0x2cd   : > { %v1393_v22 = vpop.eup %1392  ;;  %v1051_v23 = vadd.f32 1.0, %v1391_v18 }
 0x2ce   : > { %v1395_v24 = vpop.eup %1394  ;;  %1404 = vrcp.f32 %v1053_v19  ;;  %v1054_v25 = vadd.f32 1.0, %v1393_v22 }
 0x2cf   : > { %1406 = vrcp.f32 %v1051_v23  ;;  %v1052_v20 = vadd.f32 1.0, %v1395_v24 }
 0x2d0   : > { %v1397_v26 = vpop.eup %1396  ;;  %1408 = vrcp.f32 %v1054_v25 }
 0x2d1   : > { %v1399_v27 = vpop.eup %1398  ;;  %1097 = vst [vmem:[%s1663_s21 + $0x50] sm:$0xff] %v1397_v26  ;;  %1410 = vrcp.f32 %v1052_v20 }
 0x2d2   : > { %v1401_v28 = vpop.eup %1400  ;;  %1095 = vst [vmem:[%s1663_s21 + $0x40] sm:$0xff] %v1399_v27 }
 0x2d3   : > { %v1403_v29 = vpop.eup %1402  ;;  %1098 = vst [vmem:[%s1663_s21 + $0x58] sm:$0xff] %v1401_v28 }
 0x2d4   : > { %1096 = vst [vmem:[%s1663_s21 + $0x48] sm:$0xff] %v1403_v29 }
 0x2d8   : > { %v1405_v30 = vpop.eup %1404 }
 0x2d9   : > { %v1407_v31 = vpop.eup %1406  ;;  %1101 = vst [vmem:[%s1663_s21 + $0x70] sm:$0xff] %v1405_v30 }
 0x2da   : > { %v1409_v32 = vpop.eup %1408  ;;  %1099 = vst [vmem:[%s1663_s21 + $0x60] sm:$0xff] %v1407_v31 }
 0x2db   : > { %v1411_v21 = vpop.eup %1410  ;;  %1102 = vst [vmem:[%s1663_s21 + $0x78] sm:$0xff] %v1409_v32 }
 0x2dc   : > { %1100 = vst [vmem:[%s1663_s21 + $0x68] sm:$0xff] %v1411_v21 }
 0x2dd PF: > { %s19_s30 = sadd.s32 1, %s1418_s30  }
 0x2de   : > { %p16_p4 = scmp.ge.s32.totalorder %s19_s30, 4  }
 0x2e0   :  { %18 = sbr.rel (!%p16_p4) target bundleno = 1 (0x1), region = 92 }

</bundles_post_ra>
